<compile_context>
chip_gen: v6e
topology: v6e:2x2x1
jax: 0.10.0
libtpu: 0.0.40
codegen_flags: <defaults>
</compile_context>

<pallas_src>
import functools

import jax
import jax.numpy as jnp
from jax import lax
from jax.experimental import pallas as pl
from jax.experimental.pallas import tpu as pltpu

LANE = 128
SUBLANE_BF16 = 16   # bf16 vreg is (16, 128)


def _round_up(x, m):
    return ((x + m - 1) // m) * m


def _pad2(a, rows, cols):
    return jnp.pad(a, ((0, rows - a.shape[0]), (0, cols - a.shape[1])))


def nar_net_kernel(x_ref, wqkv_ref, wo_ref, w1_ref, w2_ref, wout_ref,
                   o_ref, f_ref, *, keys_visible, seq_len,
                   needs_key_pad_mask, d_pad):
    """Fused decoder block + tiled vocab projection.

    Grid axis 0 tiles the (padded) vocab.  The transformer body is evaluated
    once (first vocab tile) and its hidden plane is carried across tiles in a
    bf16 VMEM scratch (f_ref).  Every tile then does one lane-dense
    (Sp, Dp) @ (Dp, Tv) MXU pass and a lane-dense store.

    x_ref:    (Sp, Dp)      bf16  embedded (constant) mask-token sequence
    wqkv_ref: (Dp, 3*Dp)    bf16  fused [wq*1/sqrt(D) | wk | wv]
    wout_ref: (Dp, Tv)      bf16  vocab tile of the output projection
    o_ref:    (Sp, Tv)      f32   logits tile
    f_ref:    (Sp, Dp)      bf16  scratch: post-FFN hidden plane
    """
    @pl.when(pl.program_id(0) == 0)
    def _compute_hidden():
        x = x_ref[...]                                   # (Sp, Dp) bf16
        xf = x.astype(jnp.float32)

        if keys_visible:
            # Fused QKV projection: one wide MXU pass, static lane-aligned
            # slices.  1/sqrt(D) is already folded into the q columns.
            qkv = jnp.dot(x, wqkv_ref[...],
                          preferred_element_type=jnp.float32)   # (Sp, 3Dp)
            q = qkv[:, 0 * d_pad:1 * d_pad]
            k = qkv[:, 1 * d_pad:2 * d_pad]
            v = qkv[:, 2 * d_pad:3 * d_pad]

            # scores: contract last dims directly, no materialized k.T
            scores = lax.dot_general(
                q.astype(jnp.bfloat16), k.astype(jnp.bfloat16),
                dimension_numbers=(((1,), (1,)), ((), ())),
                preferred_element_type=jnp.float32)             # (Sp, Sp)
            if needs_key_pad_mask:
                # Padded keys must not take softmax mass.
                col = lax.broadcasted_iota(jnp.int32, scores.shape, 1)
                scores = jnp.where(col < seq_len, scores, jnp.float32(-1e9))

            s_max = jnp.max(scores, axis=-1, keepdims=True)
            p = jnp.exp(scores - s_max)
            denom = jnp.sum(p, axis=-1, keepdims=True)
            attn = p * pl.reciprocal(denom, approx=True)
            ctx = jnp.dot(attn.astype(jnp.bfloat16), v.astype(jnp.bfloat16),
                          preferred_element_type=jnp.float32)   # (Sp, Dp)
        else:
            # mask_index == pad_value: every key masked -> uniform attention.
            # Skip q/k/scores; ctx rows are the mean over the first S rows of v
            # (explicitly masked, no reliance on zero padding).
            v = jnp.dot(x, wqkv_ref[:, pl.ds(2 * d_pad, d_pad)],
                        preferred_element_type=jnp.float32)
            row = lax.broadcasted_iota(jnp.int32, v.shape, 0)
            vmean = jnp.sum(jnp.where(row < seq_len, v, 0.0),
                            axis=0, keepdims=True) * (1.0 / seq_len)
            ctx = jnp.broadcast_to(vmean, v.shape)

        o = jnp.dot(ctx.astype(jnp.bfloat16), wo_ref[...],
                    preferred_element_type=jnp.float32) + xf
        h = jnp.maximum(
            jnp.dot(o.astype(jnp.bfloat16), w1_ref[...],
                    preferred_element_type=jnp.float32), 0.0)
        f = jnp.dot(h.astype(jnp.bfloat16), w2_ref[...],
                    preferred_element_type=jnp.float32) + o
        f_ref[...] = f.astype(f_ref.dtype)

    # Per-vocab-tile output projection: lane-dense (Sp, Tv) store.
    o_ref[...] = jnp.dot(f_ref[...], wout_ref[...],
                         preferred_element_type=jnp.float32).astype(o_ref.dtype)


def make_params(key, vocab, max_seq_len, d_model, d_ff):
    ks = jax.random.split(key, 9)
    s = 0.02
    return {
        "tok_emb": jax.random.normal(ks[0], (vocab, d_model), jnp.float32) * s,
        "pos_emb": jax.random.normal(ks[1], (max_seq_len, d_model), jnp.float32) * s,
        "wq": jax.random.normal(ks[2], (d_model, d_model), jnp.float32) * s,
        "wk": jax.random.normal(ks[3], (d_model, d_model), jnp.float32) * s,
        "wv": jax.random.normal(ks[4], (d_model, d_model), jnp.float32) * s,
        "wo": jax.random.normal(ks[5], (d_model, d_model), jnp.float32) * s,
        "w1": jax.random.normal(ks[6], (d_model, d_ff), jnp.float32) * s,
        "w2": jax.random.normal(ks[7], (d_ff, d_model), jnp.float32) * s,
        "wout": jax.random.normal(ks[8], (d_model, vocab), jnp.float32) * s,
    }


def prepare_net_weights(params):
    """One-time weight prep: pad to lane multiples, cast to bf16, fuse QKV and
    fold 1/sqrt(D) into the q columns.  Cache the result alongside params."""
    D = params["wq"].shape[0]
    FF = params["w1"].shape[1]
    V = params["wout"].shape[1]
    Dp = _round_up(D, LANE)
    FFp = _round_up(FF, LANE)
    Vp = _round_up(V, LANE)
    scale = 1.0 / (D ** 0.5)

    def bf16_pad(a, r, c):
        return _pad2(a, r, c).astype(jnp.bfloat16)

    wqkv = jnp.concatenate(
        [bf16_pad(params["wq"] * scale, Dp, Dp),   # scale folded weight-side
         bf16_pad(params["wk"], Dp, Dp),
         bf16_pad(params["wv"], Dp, Dp)], axis=1)  # (Dp, 3*Dp)

    return {
        "wqkv": wqkv,
        "wo": bf16_pad(params["wo"], Dp, Dp),
        "w1": bf16_pad(params["w1"], Dp, FFp),
        "w2": bf16_pad(params["w2"], FFp, Dp),
        "wout": bf16_pad(params["wout"], Dp, Vp),
        "dims": (D, FF, V, Dp, FFp, Vp),
    }


def non_autoregressive_wrapper_forward(x_tokens, params, prepped, *,
                                       mask_index, pad_value=0,
                                       vocab_tile_lanes=512):
    """Mirrors NonAutoregressiveWrapper.forward for 2D token inputs."""
    B, S = x_tokens.shape
    D, FF, V, Dp, FFp, Vp = prepped["dims"]
    max_seq_len = params["pos_emb"].shape[0]
    assert S <= max_seq_len, "sequence longer than max_seq_len"

    # bf16-native 16-row sublane tile.
    Sp = _round_up(S, SUBLANE_BF16)

    # inp = full(x.shape, mask_index): every batch row is the same sequence and
    # self_attn_context_mask = (mask_index != pad_value) is a trace-time scalar.
    keys_visible = bool(int(mask_index) != int(pad_value))

    # Constant embedded input (single row broadcast of tok_emb[mask_index]).
    x_emb = params["tok_emb"][mask_index][None, :] + params["pos_emb"][:S]   # (S, D)
    x_pad = _pad2(x_emb, Sp, Dp).astype(jnp.bfloat16)

    # Vocab tile (lane-dense); streamed/double-buffered by the BlockSpec pipeline.
    Tv = min(Vp, _round_up(vocab_tile_lanes, LANE))
    grid = (pl.cdiv(Vp, Tv),)

    kernel = functools.partial(
        nar_net_kernel,
        keys_visible=keys_visible,
        seq_len=S,
        needs_key_pad_mask=(Sp > S),
        d_pad=Dp)

    logits_pad = pl.pallas_call(
        kernel,
        out_shape=jax.ShapeDtypeStruct((Sp, Vp), jnp.float32),
        grid_spec=pltpu.PrefetchScalarGridSpec(
            num_scalar_prefetch=0,
            grid=grid,
            in_specs=[
                pl.BlockSpec((Sp, Dp),     lambda j: (0, 0)),   # x (resident)
                pl.BlockSpec((Dp, 3 * Dp), lambda j: (0, 0)),   # fused qkv
                pl.BlockSpec((Dp, Dp),     lambda j: (0, 0)),   # wo
                pl.BlockSpec((Dp, FFp),    lambda j: (0, 0)),   # w1
                pl.BlockSpec((FFp, Dp),    lambda j: (0, 0)),   # w2
                pl.BlockSpec((Dp, Tv),     lambda j: (0, j)),   # wout tile
            ],
            out_specs=pl.BlockSpec((Sp, Tv), lambda j: (0, j)),
            scratch_shapes=[pltpu.VMEM((Sp, Dp), jnp.bfloat16)],
        ),
        compiler_params=pltpu.CompilerParams(
            # Vocab axis carries the hidden-plane scratch -> "arbitrary".
            dimension_semantics=("arbitrary",),
            vmem_limit_bytes=32 * 1024 * 1024,
        ),
    )(x_pad, prepped["wqkv"], prepped["wo"], prepped["w1"],
      prepped["w2"], prepped["wout"])

    # Strip padding (at real vocab sizes, defer this slice to the consumer) and
    # broadcast the (identical) logits lazily over the batch.
    logits = logits_pad[:S, :V]
    return jnp.broadcast_to(logits[None, :, :], (B, S, V))


if __name__ == "__main__":
    # Small shapes consistent with the module's forward (2D token input).
    B, S = 2, 8              # batch, seq
    D, FF, V = 32, 64, 16    # hidden, ffn, vocab (num_tokens)
    MASK_INDEX = 2
    PAD_VALUE = 0
    MAX_SEQ_LEN = 8

    key = jax.random.PRNGKey(0)
    k_params, k_x = jax.random.split(key)
    params = make_params(k_params, V, MAX_SEQ_LEN, D, FF)
    prepped = prepare_net_weights(params)      # cached once, reused every call

    # x is only used as a shape/device donor in the original forward.
    x_tokens = jax.random.randint(k_x, (B, S), minval=0, maxval=V, dtype=jnp.int32)

    out = non_autoregressive_wrapper_forward(
        x_tokens, params, prepped, mask_index=MASK_INDEX, pad_value=PAD_VALUE)
    jax.block_until_ready(out)

    # ---- pure-JAX reference of the same synthetic net (same bf16/f32 pattern) ----
    def dot32(a, b):
        return jnp.dot(a.astype(jnp.bfloat16), b.astype(jnp.bfloat16),
                       preferred_element_type=jnp.float32)

    scale = 1.0 / (D ** 0.5)
    xe = (params["tok_emb"][MASK_INDEX][None, :] + params["pos_emb"][:S])        # (S, D)
    xe_bf = xe.astype(jnp.bfloat16)
    xe_f = xe_bf.astype(jnp.float32)

    q = dot32(xe_bf, params["wq"] * scale)     # scale folded weight-side, like kernel
    k = dot32(xe_bf, params["wk"])
    v = dot32(xe_bf, params["wv"])
    sc = jax.lax.dot_general(q.astype(jnp.bfloat16), k.astype(jnp.bfloat16),
                             (((1,), (1,)), ((), ())),
                             preferred_element_type=jnp.float32)
    # mask_index != pad_value -> context mask is all True -> plain softmax.
    attn = jax.nn.softmax(sc, axis=-1)
    ctx = jnp.dot(attn.astype(jnp.bfloat16), v.astype(jnp.bfloat16),
                  preferred_element_type=jnp.float32)
    o = dot32(ctx, params["wo"]) + xe_f
    h = jnp.maximum(dot32(o, params["w1"]), 0.0)
    f = dot32(h, params["w2"]) + o
    ref_logits = dot32(f, params["wout"])                                        # (S, V)
    ref = jnp.broadcast_to(ref_logits[None], (B, S, V))

    assert out.shape == (B, S, V)
    assert jnp.allclose(out, ref, atol=1e-3, rtol=1e-2), (
        float(jnp.max(jnp.abs(out - ref))))

    print("KERNEL_OK")
</pallas_src>

<mosaic_0001>
module attributes {stable_mosaic.version = 11 : i64} {
  func.func @nar_net_kernel(%arg0: i32, %arg1: memref<16x128xbf16, #tpu.memory_space<vmem>>, %arg2: memref<128x384xbf16, #tpu.memory_space<vmem>>, %arg3: memref<128x128xbf16, #tpu.memory_space<vmem>>, %arg4: memref<128x128xbf16, #tpu.memory_space<vmem>>, %arg5: memref<128x128xbf16, #tpu.memory_space<vmem>>, %arg6: memref<128x128xbf16, #tpu.memory_space<vmem>>, %arg7: memref<16x128xf32, #tpu.memory_space<vmem>>, %arg8: memref<16x128xbf16, #tpu.memory_space<vmem>>) attributes {dimension_semantics = [#tpu.dimension_semantics<arbitrary>], iteration_bounds = array<i64: 1>, scalar_prefetch = 0 : i64, scratch_operands = 1 : i64, tpu.core_type = #tpu.core_type<tc>, window_params = [{pipeline_mode = #tpu.pipeline_mode<synchronous>, transform_indices = @transform_0, window_bounds = array<i64: 16, 128>}, {pipeline_mode = #tpu.pipeline_mode<synchronous>, transform_indices = @transform_1, window_bounds = array<i64: 128, 384>}, {pipeline_mode = #tpu.pipeline_mode<synchronous>, transform_indices = @transform_2, window_bounds = array<i64: 128, 128>}, {pipeline_mode = #tpu.pipeline_mode<synchronous>, transform_indices = @transform_3, window_bounds = array<i64: 128, 128>}, {pipeline_mode = #tpu.pipeline_mode<synchronous>, transform_indices = @transform_4, window_bounds = array<i64: 128, 128>}, {transform_indices = @transform_5, window_bounds = array<i64: 128, 128>}, {transform_indices = @transform_6, window_bounds = array<i64: 16, 128>}]} {
    %c0_i32 = arith.constant 0 : i32
    %0 = arith.cmpi eq, %arg0, %c0_i32 : i32
    %1 = arith.extui %0 : i1 to i32
    %c0_i32_0 = arith.constant 0 : i32
    %2 = arith.cmpi ne, %1, %c0_i32_0 : i32
    scf.if %2 {
      %c0_6 = arith.constant 0 : index
      %c0_7 = arith.constant 0 : index
      %7 = vector.load %arg1[%c0_6, %c0_7] : memref<16x128xbf16, #tpu.memory_space<vmem>>, vector<16x128xbf16>
      %8 = arith.extf %7 : vector<16x128xbf16> to vector<16x128xf32>
      %c0_8 = arith.constant 0 : index
      %c0_9 = arith.constant 0 : index
      %9 = vector.load %arg2[%c0_8, %c0_9] : memref<128x384xbf16, #tpu.memory_space<vmem>>, vector<128x384xbf16>
      %cst_10 = arith.constant dense<0.000000e+00> : vector<16x384xf32>
      %10 = tpu.matmul %7, %9, %cst_10 {dimension_numbers = #tpu.dot_dimension_numbers<[1], [0], [0], [1], [0, 0, 1, 1], [], []>} : vector<16x128xbf16>, vector<128x384xbf16>, vector<16x384xf32> -> vector<16x384xf32>
      %11 = vector.extract_strided_slice %10 {offsets = [0, 0], sizes = [16, 128], strides = [1, 1]} : vector<16x384xf32> to vector<16x128xf32>
      %12 = vector.extract_strided_slice %10 {offsets = [0, 128], sizes = [16, 128], strides = [1, 1]} : vector<16x384xf32> to vector<16x128xf32>
      %13 = vector.extract_strided_slice %10 {offsets = [0, 256], sizes = [16, 128], strides = [1, 1]} : vector<16x384xf32> to vector<16x128xf32>
      %14 = arith.truncf %11 : vector<16x128xf32> to vector<16x128xbf16>
      %15 = arith.truncf %12 : vector<16x128xf32> to vector<16x128xbf16>
      %cst_11 = arith.constant dense<0.000000e+00> : vector<16x16xf32>
      %16 = tpu.matmul %14, %15, %cst_11 {dimension_numbers = #tpu.dot_dimension_numbers<[1], [1], [0], [0], [0, 0, 1, 0], [], []>} : vector<16x128xbf16>, vector<16x128xbf16>, vector<16x16xf32> -> vector<16x16xf32>
      %17 = tpu.iota {dimensions = array<i32: 1>} : vector<16x16xi32>
      %c8_i32 = arith.constant 8 : i32
      %18 = vector.broadcast %c8_i32 : i32 to vector<16x16xi32>
      %19 = arith.cmpi slt, %17, %18 : vector<16x16xi32>
      %cst_12 = arith.constant -1.000000e+09 : f32
      %20 = vector.broadcast %cst_12 : f32 to vector<16x16xf32>
      %21 = arith.select %19, %16, %20 : vector<16x16xi1>, vector<16x16xf32>
      %cst_13 = arith.constant dense<0xFF800000> : vector<16xf32>
      %22 = vector.multi_reduction <maximumf>, %21, %cst_13 [1] : vector<16x16xf32> to vector<16xf32>
      %23 = vector.shape_cast %22 : vector<16xf32> to vector<16x1xf32>
      %24 = vector.broadcast %23 : vector<16x1xf32> to vector<16x16xf32>
      %25 = arith.subf %21, %24 : vector<16x16xf32>
      %26 = math.exp %25 : vector<16x16xf32>
      %cst_14 = arith.constant dense<0.000000e+00> : vector<16xf32>
      %27 = vector.multi_reduction <add>, %26, %cst_14 [1] : vector<16x16xf32> to vector<16xf32>
      %28 = vector.shape_cast %27 : vector<16xf32> to vector<16x1xf32>
      %29 = tpu.reciprocal %28 {approx = true} : vector<16x1xf32> -> vector<16x1xf32>
      %30 = vector.broadcast %29 : vector<16x1xf32> to vector<16x16xf32>
      %31 = arith.mulf %26, %30 : vector<16x16xf32>
      %32 = arith.truncf %31 : vector<16x16xf32> to vector<16x16xbf16>
      %33 = arith.truncf %13 : vector<16x128xf32> to vector<16x128xbf16>
      %cst_15 = arith.constant dense<0.000000e+00> : vector<16x128xf32>
      %34 = tpu.matmul %32, %33, %cst_15 {dimension_numbers = #tpu.dot_dimension_numbers<[1], [0], [0], [1], [0, 0, 1, 1], [], []>} : vector<16x16xbf16>, vector<16x128xbf16>, vector<16x128xf32> -> vector<16x128xf32>
      %35 = arith.truncf %34 : vector<16x128xf32> to vector<16x128xbf16>
      %c0_16 = arith.constant 0 : index
      %c0_17 = arith.constant 0 : index
      %36 = vector.load %arg3[%c0_16, %c0_17] : memref<128x128xbf16, #tpu.memory_space<vmem>>, vector<128x128xbf16>
      %cst_18 = arith.constant dense<0.000000e+00> : vector<16x128xf32>
      %37 = tpu.matmul %35, %36, %cst_18 {dimension_numbers = #tpu.dot_dimension_numbers<[1], [0], [0], [1], [0, 0, 1, 1], [], []>} : vector<16x128xbf16>, vector<128x128xbf16>, vector<16x128xf32> -> vector<16x128xf32>
      %38 = arith.addf %37, %8 : vector<16x128xf32>
      %39 = arith.truncf %38 : vector<16x128xf32> to vector<16x128xbf16>
      %c0_19 = arith.constant 0 : index
      %c0_20 = arith.constant 0 : index
      %40 = vector.load %arg4[%c0_19, %c0_20] : memref<128x128xbf16, #tpu.memory_space<vmem>>, vector<128x128xbf16>
      %cst_21 = arith.constant dense<0.000000e+00> : vector<16x128xf32>
      %41 = tpu.matmul %39, %40, %cst_21 {dimension_numbers = #tpu.dot_dimension_numbers<[1], [0], [0], [1], [0, 0, 1, 1], [], []>} : vector<16x128xbf16>, vector<128x128xbf16>, vector<16x128xf32> -> vector<16x128xf32>
      %cst_22 = arith.constant 0.000000e+00 : f32
      %42 = vector.broadcast %cst_22 : f32 to vector<16x128xf32>
      %43 = arith.maximumf %41, %42 : vector<16x128xf32>
      %44 = arith.truncf %43 : vector<16x128xf32> to vector<16x128xbf16>
      %c0_23 = arith.constant 0 : index
      %c0_24 = arith.constant 0 : index
      %45 = vector.load %arg5[%c0_23, %c0_24] : memref<128x128xbf16, #tpu.memory_space<vmem>>, vector<128x128xbf16>
      %cst_25 = arith.constant dense<0.000000e+00> : vector<16x128xf32>
      %46 = tpu.matmul %44, %45, %cst_25 {dimension_numbers = #tpu.dot_dimension_numbers<[1], [0], [0], [1], [0, 0, 1, 1], [], []>} : vector<16x128xbf16>, vector<128x128xbf16>, vector<16x128xf32> -> vector<16x128xf32>
      %47 = arith.addf %46, %38 : vector<16x128xf32>
      %48 = arith.truncf %47 : vector<16x128xf32> to vector<16x128xbf16>
      %c0_26 = arith.constant 0 : index
      %c0_27 = arith.constant 0 : index
      %49 = vector.load %arg8[%c0_26, %c0_27] : memref<16x128xbf16, #tpu.memory_space<vmem>>, vector<16x128xbf16>
      tpu.vector_store %arg8[%c0_26, %c0_27], %48 {strides = array<i32>} : memref<16x128xbf16, #tpu.memory_space<vmem>>, vector<16x128xbf16>,
    } else {
    }
    %c0 = arith.constant 0 : index
    %c0_1 = arith.constant 0 : index
    %3 = vector.load %arg8[%c0, %c0_1] : memref<16x128xbf16, #tpu.memory_space<vmem>>, vector<16x128xbf16>
    %c0_2 = arith.constant 0 : index
    %c0_3 = arith.constant 0 : index
    %4 = vector.load %arg6[%c0_2, %c0_3] : memref<128x128xbf16, #tpu.memory_space<vmem>>, vector<128x128xbf16>
    %cst = arith.constant dense<0.000000e+00> : vector<16x128xf32>
    %5 = tpu.matmul %3, %4, %cst {dimension_numbers = #tpu.dot_dimension_numbers<[1], [0], [0], [1], [0, 0, 1, 1], [], []>} : vector<16x128xbf16>, vector<128x128xbf16>, vector<16x128xf32> -> vector<16x128xf32>
    %c0_4 = arith.constant 0 : index
    %c0_5 = arith.constant 0 : index
    %6 = vector.load %arg7[%c0_4, %c0_5] : memref<16x128xf32, #tpu.memory_space<vmem>>, vector<16x128xf32>
    tpu.vector_store %arg7[%c0_4, %c0_5], %5 {strides = array<i32>} : memref<16x128xf32, #tpu.memory_space<vmem>>, vector<16x128xf32>,
    return
  }
  func.func @transform_0(%arg0: i32) -> (i32, i32) {
    %c0_i32 = arith.constant 0 : i32
    %c0_i32_0 = arith.constant 0 : i32
    %c0_i32_1 = arith.constant 0 : i32
    return %c0_i32, %c0_i32_0 : i32, i32
  }
  func.func @transform_1(%arg0: i32) -> (i32, i32) {
    %c0_i32 = arith.constant 0 : i32
    %c0_i32_0 = arith.constant 0 : i32
    %c0_i32_1 = arith.constant 0 : i32
    return %c0_i32, %c0_i32_0 : i32, i32
  }
  func.func @transform_2(%arg0: i32) -> (i32, i32) {
    %c0_i32 = arith.constant 0 : i32
    %c0_i32_0 = arith.constant 0 : i32
    %c0_i32_1 = arith.constant 0 : i32
    return %c0_i32, %c0_i32_0 : i32, i32
  }
  func.func @transform_3(%arg0: i32) -> (i32, i32) {
    %c0_i32 = arith.constant 0 : i32
    %c0_i32_0 = arith.constant 0 : i32
    %c0_i32_1 = arith.constant 0 : i32
    return %c0_i32, %c0_i32_0 : i32, i32
  }
  func.func @transform_4(%arg0: i32) -> (i32, i32) {
    %c0_i32 = arith.constant 0 : i32
    %c0_i32_0 = arith.constant 0 : i32
    %c0_i32_1 = arith.constant 0 : i32
    return %c0_i32, %c0_i32_0 : i32, i32
  }
  func.func @transform_5(%arg0: i32) -> (i32, i32) {
    %c0_i32 = arith.constant 0 : i32
    %c0_i32_0 = arith.constant 0 : i32
    return %c0_i32, %arg0 : i32, i32
  }
  func.func @transform_6(%arg0: i32) -> (i32, i32) {
    %c0_i32 = arith.constant 0 : i32
    %c0_i32_0 = arith.constant 0 : i32
    return %c0_i32, %arg0 : i32, i32
  }
}

</mosaic_0001>

<bundles_post_ra>
// kernel: tpu_custom_call.1
= control target key start
LH: loop header
LB: loop body
LE: loop exit
PB: predicated region body
PF: predicated region fallthrough
CT: control target
= control target key end

     0   :  { %11 = vsyncpa [#allocation4], 0  ;;  %s1571_s0 = inlined_call_operand.hbm [shape: bf16[16,128], index: 0, kind: input, shape index: {}]   ;;  %s1572_s1 = inlined_call_operand.hbm [shape: bf16[128,384], index: 1, kind: input, shape index: {}]   ;;  %s1573_s2 = inlined_call_operand.hbm [shape: bf16[128,128], index: 2, kind: input, shape index: {}]   ;;  %s1574_s3 = inlined_call_operand.hbm [shape: bf16[128,128], index: 3, kind: input, shape index: {}]   ;;  %s1575_s4 = inlined_call_operand.hbm [shape: bf16[128,128], index: 4, kind: input, shape index: {}]   ;;  %s1576_s5 = inlined_call_operand.hbm [shape: bf16[128,128], index: 5, kind: input, shape index: {}]   ;;  %s1577_s6 = inlined_call_operand.hbm [shape: f32[16,128], index: 6, kind: output, shape index: {}]  }
   0x1   :  { %12 = vsyncpa [#allocation7], 0 }
   0x2   :  { %13 = vsyncpa [#allocation10], 0 }
   0x3   :  { %14 = vsyncpa [#allocation13], 0 }
   0x4   :  { %15 = vsyncpa [#allocation5], 0  ;;  %s1417_s21 = smov [#allocation6]  }
   0x5   :  { %s33_s22 = sshll.u32 %s1417_s21, 4  ;;  %s34_s22 = int_to_ptr.vmem [resolvable:$true] %s33_s22 }
   0x6   :  { %s1275_s23 = scalar_lea.vmem %s34_s22, 3072  ;;  %p1280_p1 = scmp.lt.s32.totalorder %s34_s22, %s34_s22 }
   0x7   :  { %p1276_p0 = scmp.ne.s32.totalorder %s34_s22, %s1275_s23  ;;  %p1281_p2 = scmp.lt.s32.totalorder %s1275_s23, %s1275_s23 }
   0x9   :  { %p1282_p3 = por %p1281_p2, %p1280_p1 }
   0xb   :  { %p1283_p4 = pnand %p1282_p3, %p1276_p0 }
   0xd   :  { %1286 = shalt.err (!%p1283_p4)
}
   0xe   :  { %s1418_s24 = smov 192   ;;  %s1419_s25 = smov 12  }
   0xf   :  { %39 = dma.hbm_to_vmem [thread:$0]  %s1572_s1, 3072, %s34_s22, [#allocation7], %s1418_s24, %s1418_s24, %s1419_s25  }
  0x10   :  { %s1420_s28 = smov [#allocation9]   ;;  %s1421_s30 = smov [#allocation3]  }
  0x11   :  { %s57_s29 = sshll.u32 %s1420_s28, 4  ;;  %s21_s7 = sshll.u32 %s1421_s30, 4  ;;  %s58_s29 = int_to_ptr.vmem [resolvable:$true] %s57_s29  ;;  %s22_s7 = int_to_ptr.vmem [resolvable:$true] %s21_s7 }
  0x12   :  { %s1295_s8 = scalar_lea.vmem %s58_s29, 1024  ;;  %p1300_p6 = scmp.lt.s32.totalorder %s58_s29, %s58_s29 }
  0x13   :  { %p1296_p5 = scmp.ne.s32.totalorder %s58_s29, %s1295_s8  ;;  %p1301_p7 = scmp.lt.s32.totalorder %s1295_s8, %s1295_s8 }
  0x15   :  { %p1302_p8 = por %p1301_p7, %p1300_p6 }
  0x17   :  { %p1303_p9 = pnand %p1302_p8, %p1296_p5 }
  0x19   :  { %1306 = shalt.err (!%p1303_p9)
}
  0x1a   :  { %s1422_s9 = smov 64   ;;  %s1423_s10 = smov 4  }
  0x1b   :  { %63 = dma.hbm_to_vmem [thread:$0]  %s1574_s3, 1024, %s58_s29, [#allocation10], %s1422_s9, %s1422_s9, %s1423_s10  }
  0x1c   :  { %s1315_s1 = scalar_lea.vmem %s22_s7, 128  ;;  %p1320_p11 = scmp.lt.s32.totalorder %s22_s7, %s22_s7 }
  0x1d   :  { %p1316_p10 = scmp.ne.s32.totalorder %s22_s7, %s1315_s1  ;;  %p1321_p12 = scmp.lt.s32.totalorder %s1315_s1, %s1315_s1 }
  0x1f   :  { %p1322_p13 = por %p1321_p12, %p1320_p11 }
  0x21   :  { %p1323_p0 = pnand %p1322_p13, %p1316_p10 }
  0x23   :  { %1326 = shalt.err (!%p1323_p0)
}
  0x24   :  { %27 = dma.hbm_to_vmem [thread:$0]  %s1571_s0, 128, %s22_s7, [#allocation4], %s1422_s9, %s1422_s9, %s1423_s10  }
  0x25   :  { %s1424_s15 = smov [#allocation8]   ;;  %s1425_s17 = smov [#allocation11]  }
  0x26   :  { %s45_s16 = sshll.u32 %s1424_s15, 4  ;;  %s69_s3 = sshll.u32 %s1425_s17, 4  ;;  %s46_s16 = int_to_ptr.vmem [resolvable:$true] %s45_s16  ;;  %s70_s3 = int_to_ptr.vmem [resolvable:$true] %s69_s3 }
  0x27   :  { %s1335_s18 = scalar_lea.vmem %s46_s16, 1024  ;;  %p1340_p2 = scmp.lt.s32.totalorder %s46_s16, %s46_s16 }
  0x28   :  { %p1336_p1 = scmp.ne.s32.totalorder %s46_s16, %s1335_s18  ;;  %p1341_p3 = scmp.lt.s32.totalorder %s1335_s18, %s1335_s18 }
  0x2a   :  { %p1342_p4 = por %p1341_p3, %p1340_p2 }
  0x2c   :  { %p1343_p5 = pnand %p1342_p4, %p1336_p1 }
  0x2e   :  { %1346 = shalt.err (!%p1343_p5)
}
  0x2f   :  { %51 = dma.hbm_to_vmem [thread:$0]  %s1573_s2, 1024, %s46_s16, [#allocation7], %s1422_s9, %s1422_s9, %s1423_s10  }
  0x30   :  { %s1355_s0 = scalar_lea.vmem %s70_s3, 1024  ;;  %p1360_p7 = scmp.lt.s32.totalorder %s70_s3, %s70_s3 }
  0x31   :  { %p1356_p6 = scmp.ne.s32.totalorder %s70_s3, %s1355_s0  ;;  %p1361_p8 = scmp.lt.s32.totalorder %s1355_s0, %s1355_s0 }
  0x33   :  { %p1362_p9 = por %p1361_p8, %p1360_p7 }
  0x35   :  { %p1363_p10 = pnand %p1362_p9, %p1356_p6 }
  0x37   :  { %1366 = shalt.err (!%p1363_p10)
}
  0x38   :  { %75 = dma.hbm_to_vmem [thread:$0]  %s1575_s4, 1024, %s70_s3, [#allocation10], %s1422_s9, %s1422_s9, %s1423_s10  }
  0x39   :  { %s1426_s23 = smov [#allocation12]  }
  0x3a   :  { %s81_s24 = sshll.u32 %s1426_s23, 4  ;;  %s82_s24 = int_to_ptr.vmem [resolvable:$true] %s81_s24 }
  0x3b   :  { %s1375_s25 = scalar_lea.vmem %s82_s24, 1024  ;;  %p1380_p12 = scmp.lt.s32.totalorder %s82_s24, %s82_s24 }
  0x3c   :  { %p1376_p11 = scmp.ne.s32.totalorder %s82_s24, %s1375_s25  ;;  %p1381_p13 = scmp.lt.s32.totalorder %s1375_s25, %s1375_s25 }
  0x3e   :  { %p1382_p0 = por %p1381_p13, %p1380_p12 }
  0x40   :  { %p1383_p1 = pnand %p1382_p0, %p1376_p11 }
  0x42   :  { %1386 = shalt.err (!%p1383_p1)
}
  0x43   :  { %87 = dma.hbm_to_vmem [thread:$0]  %s1576_s5, 1024, %s82_s24, [#allocation13], %s1422_s9, %s1422_s9, %s1423_s10  }
  0x44   :  { %1407 = dma.done.wait [#allocation4], 128  }
  0x45   :  { %1408 = vsyncadd [#allocation4], 4294967168 }
  0x46   :  { %1409 = dma.done.wait [#allocation7], 4096  }
  0x47   :  { %1410 = vsyncadd [#allocation7], 4294963200 }
  0x48   :  { %1411 = dma.done.wait [#allocation10], 2048  }
  0x49   :  { %1412 = vsyncadd [#allocation10], 4294965248 }
  0x4a   :  { %1413 = dma.done.wait [#allocation13], 1024  }
  0x4b   :  { %1414 = vsyncadd [#allocation13], 4294966272  ;;  %v1427_v0 = vmov 0   ;;  %v1192_v1 = vld [vmem:[#allocation6 + $0xac] ss:$12 sps:$4 sm:$0xff]   ;;  %v1428_v18 = vmov 0.0   ;;  %v408_v33 = vlaneseq }
  0x4c   :  { %313 = vmatprep.mubr.bf16.mxu0 %v1427_v0  ;;  %v1194_v2 = vld [vmem:[#allocation6 + $0xa8] ss:$12 sps:$4 sm:$0xff]   ;;  %281 = vmatprep.subr.bf16.mxu0 %v1192_v1  ;;  %v1197_v4 = vld [vmem:[#allocation6 + $0x90] ss:$12 sps:$4 sm:$0xff]   ;;  %v1200_v6 = vld [vmem:[#allocation6 + $0x78] ss:$12 sps:$4 sm:$0xff]  }
  0x4d   :  { %v1195_v3 = vld [vmem:[#allocation6 + $0x94] ss:$12 sps:$4 sm:$0xff]   ;;  %282 = vmatpush1.bf16.msra.mxu0 %v1194_v2  ;;  %v1198_v5 = vld [vmem:[#allocation6 + $0x7c] ss:$12 sps:$4 sm:$0xff]   ;;  %v1201_v7 = vld [vmem:[#allocation6 + $0x64] ss:$12 sps:$4 sm:$0xff]   ;;  %1064 = vmatprep.subr.bf16.mxu1 %v1428_v18 }
  0x4e   :  { %283 = vmatprep.subr.bf16.mxu0 %v1195_v3  ;;  %v1203_v8 = vld [vmem:[#allocation6 + $0x60] ss:$12 sps:$4 sm:$0xff]   ;;  %v1206_v10 = vld [vmem:[#allocation6 + $0x48] ss:$12 sps:$4 sm:$0xff]   ;;  %v1209_v12 = vld [vmem:[#allocation6 + $0x30] ss:$12 sps:$4 sm:$0xff]  }
  0x4f   :  { %v1204_v9 = vld [vmem:[#allocation6 + $0x4c] ss:$12 sps:$4 sm:$0xff]   ;;  %v1207_v11 = vld [vmem:[#allocation6 + $0x34] ss:$12 sps:$4 sm:$0xff]   ;;  %v1210_v13 = vld [vmem:[#allocation6 + $0x1c] ss:$12 sps:$4 sm:$0xff]  }
  0x50   :  { %v1212_v14 = vld [vmem:[#allocation6 + $0x18] ss:$12 sps:$4 sm:$0xff]   ;;  %v1215_v16 = vld [vmem:[#allocation6] ss:$12 sps:$4 sm:$0xff]   ;;  %vm1429_vm0 = vmmov 0   ;;  %v409_v34 = vand.u32 127, %v408_v33 }
  0x51   :  { %284 = vmatpush1.bf16.msra.mxu0 %v1197_v4  ;;  %v1213_v15 = vld [vmem:[#allocation6 + $0x4] ss:$12 sps:$4 sm:$0xff]   ;;  %v1501_v17 = vld [vmem:[#allocation3] sm:$0xff]   ;;  %1080 = vmatprep.mubr.msk.bf16.mxu1 %vm1429_vm0, %v1428_v18  ;;  %v1219_v27 = vld [vmem:[#allocation6 + $0x80] ss:$12 sps:$4 sm:$0xff]   ;;  %vm413_vm2 = vcmask 130048  }
  0x52   :  { %285 = vmatprep.subr.bf16.mxu0 %v1198_v5  ;;  %v1217_v25 = vld [vmem:[#allocation6 + $0xb0] ss:$12 sps:$4 sm:$0xff]   ;;  %v1218_v26 = vld [vmem:[#allocation6 + $0x98] ss:$12 sps:$4 sm:$0xff]   ;;  %v1220_v28 = vld [vmem:[#allocation6 + $0x68] ss:$12 sps:$4 sm:$0xff]  }
  0x53   :  { %1065 = vmatpush3.bf16.msra.mxu1 %v1217_v25  ;;  %v1221_v29 = vld [vmem:[#allocation6 + $0x50] ss:$12 sps:$4 sm:$0xff]   ;;  %v1222_v30 = vld [vmem:[#allocation6 + $0x38] ss:$12 sps:$4 sm:$0xff]   ;;  %v1223_v31 = vld [vmem:[#allocation6 + $0x20] ss:$12 sps:$4 sm:$0xff]  }
  0x54   :  { %1066 = vmatprep.subr.bf16.mxu1 %v1428_v18  ;;  %v1224_v32 = vld [vmem:[#allocation6 + $0x8] ss:$12 sps:$4 sm:$0xff]   ;;  %vm410_vm1 = vcmp.lt.s32.totalorder %v409_v34, 8  ;;  %v1225_v58 = vld [vmem:[#allocation8 + $0x38] sm:$0xff]   ;;  %v1228_v61 = vld [vmem:[#allocation8 + $0x20] sm:$0xff]   ;;  %s1430_s4 = smov [#allocation14]  }
  0x55   :  { %286 = vmatpush1.bf16.msra.mxu0 %v1200_v6  ;;  %v1226_v59 = vld [vmem:[#allocation8 + $0x30] sm:$0xff]   ;;  %v1227_v60 = vld [vmem:[#allocation8 + $0x28] sm:$0xff]   ;;  %v1229_v62 = vld [vmem:[#allocation8 + $0x18] sm:$0xff]   ;;  %s932_s5 = sshll.u32 %s1430_s4, 4  ;;  %s933_s5 = int_to_ptr.vmem [resolvable:$true] %s932_s5 }
  0x56   :  { %287 = vmatprep.subr.bf16.mxu0 %v1201_v7  ;;  %v1230_v63 = vld [vmem:[#allocation8 + $0x10] sm:$0xff]   ;;  %v1231_v7 = vld [vmem:[#allocation8 + $0x8] sm:$0xff]   ;;  %s1387_s27 = scalar_lea.vmem %s933_s5, 256  ;;  %p1392_p3 = scmp.lt.s32.totalorder %s933_s5, %s933_s5 }
  0x57   :  { %1067 = vmatpush3.bf16.msra.mxu1 %v1218_v26  ;;  %v1242_v25 = vld [vmem:[#allocation11 + $0x30] sm:$0xff]   ;;  %v1243_v26 = vld [vmem:[#allocation11 + $0x28] sm:$0xff]   ;;  %p1388_p2 = scmp.ne.s32.totalorder %s933_s5, %s1387_s27  ;;  %p1393_p4 = scmp.lt.s32.totalorder %s1387_s27, %s1387_s27 }
  0x58   :  { %1068 = vmatprep.subr.bf16.mxu1 %v1428_v18 }
  0x59   :  { %288 = vmatpush1.bf16.msra.mxu0 %v1203_v8  ;;  %v1232_v8 = vld [vmem:[#allocation8] sm:$0xff]   ;;  %p1394_p5 = por %p1393_p4, %p1392_p3 }
  0x5a   :  { %289 = vmatprep.subr.bf16.mxu0 %v1204_v9  ;;  %v1233_v9 = vld [vmem:[#allocation9 + $0x38] sm:$0xff]  }
  0x5b   :  { %1069 = vmatpush3.bf16.msra.mxu1 %v1219_v27  ;;  %v1244_v27 = vld [vmem:[#allocation11 + $0x20] sm:$0xff]   ;;  %p1395_p6 = pnand %p1394_p5, %p1388_p2 }
  0x5c   :  { %1070 = vmatprep.subr.bf16.mxu1 %v1428_v18 }
  0x5d   :  { %290 = vmatpush1.bf16.msra.mxu0 %v1206_v10  ;;  %v1234_v10 = vld [vmem:[#allocation9 + $0x30] sm:$0xff]  }
  0x5e   :  { %291 = vmatprep.subr.bf16.mxu0 %v1207_v11  ;;  %v1235_v11 = vld [vmem:[#allocation9 + $0x28] sm:$0xff]  }
  0x5f   :  { %1071 = vmatpush3.bf16.msra.mxu1 %v1220_v28  ;;  %v1245_v28 = vld [vmem:[#allocation11 + $0x18] sm:$0xff]  }
  0x60   :  { %1072 = vmatprep.subr.bf16.mxu1 %v1428_v18 }
  0x61   :  { %292 = vmatpush1.bf16.msra.mxu0 %v1209_v12  ;;  %v1236_v12 = vld [vmem:[#allocation9 + $0x20] sm:$0xff]  }
  0x62   :  { %293 = vmatprep.subr.bf16.mxu0 %v1210_v13  ;;  %v1237_v13 = vld [vmem:[#allocation9 + $0x18] sm:$0xff]  }
  0x63   :  { %1073 = vmatpush3.bf16.msra.mxu1 %v1221_v29  ;;  %v1246_v29 = vld [vmem:[#allocation11 + $0x10] sm:$0xff]  }
  0x64   :  { %1074 = vmatprep.subr.bf16.mxu1 %v1428_v18 }
  0x65   :  { %294 = vmatpush1.bf16.msra.mxu0 %v1212_v14  ;;  %v1238_v14 = vld [vmem:[#allocation9 + $0x10] sm:$0xff]  }
  0x66   :  { %295 = vmatprep.subr.bf16.mxu0 %v1213_v15 }
  0x67   :  { %1075 = vmatpush3.bf16.msra.mxu1 %v1222_v30 }
  0x68   :  { %1076 = vmatprep.subr.bf16.mxu1 %v1428_v18 }
  0x69   :  { %296 = vmatpush1.bf16.msra.mxu0 %v1215_v16 }
  0x6a   :  { %1084 = vmatprep.subr.bf16.mxu0 %v1428_v18 }
  0x6b   :  { %1077 = vmatpush3.bf16.msra.mxu1 %v1223_v31  ;;  %v113_v31 = vunpack.c.l.bf16 %v1501_v17 }
  0x6c   :  { %314 = vmatmul.mubr.bf16.vlgmr.msra.gmra.mxu0 %v1501_v17  ;;  %1078 = vmatprep.subr.bf16.mxu1 %v1428_v18 }
  0x6d   :  { %1086 = vmatprep.mubr.msk.bf16.mxu0 %vm1429_vm0, %v1428_v18 }
  0x6f   :  { %1079 = vmatpush3.bf16.msra.mxu1 %v1224_v32  ;;  %v114_v32 = vunpack.c.h.bf16 %v1501_v17 }
  0x70   :  { %1090 = vmatprep.subr.bf16.mxu1 %v1428_v18 }
  0x72   :  { %1081 = vmatmul.mubr.bf16.vlgmr.msra.gmra.mxu1 %v1501_v17  ;;  %v1251_v17 = vld [vmem:[#allocation12 + $0x28] sm:$0xff]  }
  0x73   :  { %1092 = vmatprep.mubr.msk.bf16.mxu1 %vm1429_vm0, %v1428_v18 }
 0x12c   :  { %v315_v19 = vpop.f32.mrf.mxu0 }
 0x12e   :  { %v317_v20 = vpop.f32.mrf.mxu0 }
 0x130   :  { %v319_v21 = vpop.f32.mrf.mxu0 }
 0x131   :  { %v365_v24 = vpack.c.bf16 %v319_v21, %v315_v19 }
 0x132   :  { %v321_v22 = vpop.f32.mrf.mxu0  ;;  %v358_v53 = vpop.f32.mrf.mxu1 }
 0x133   :  { %v366_v23 = vpack.c.bf16 %v321_v22, %v317_v20  ;;  %v1239_v22 = vld [vmem:[#allocation9 + $0x8] sm:$0xff]  }
 0x134   :  { %v1082_v54 = vpop.f32.mrf.mxu1 }
 0x135   :  { %1085 = vmatpush3.bf16.xpose.msra.mxu0 %v366_v23  ;;  %v1240_v23 = vld [vmem:[#allocation9] sm:$0xff]  }
 0x136   :  { %1096 = vmatprep.subr.bf16.mxu0 %v1428_v18  ;;  %v361_v55 = vpop.f32.mrf.mxu1  ;;  %v1256_v54 = vld [vmem:[#allocation12] sm:$0xff]  }
 0x137   :  { %v437_v57 = vpack.c.bf16 %v361_v55, %v358_v53  ;;  %v1255_v53 = vld [vmem:[#allocation12 + $0x8] sm:$0xff]  }
 0x138   :  { %v1083_v56 = vpop.f32.mrf.mxu1 }
 0x139   :  { %1091 = vmatpush3.bf16.msra.mxu1 %v437_v57 }
 0x13a   :  { %1116 = vmatprep.subr.bf16.mxu1 %v1428_v18 }
 0x13c   :  { %1087 = vmatmul.mubr.bf16.vlgmr.msra.gmra.mxu0 %v365_v24  ;;  %v1241_v24 = vld [vmem:[#allocation11 + $0x38] sm:$0xff]  }
 0x13d   :  { %1112 = vmatprep.mubr.msk.bf16.mxu0 %vm1429_vm0, %v1428_v18  ;;  %1097 = vmatpush3.bf16.msra.mxu0 %v1225_v58 }
 0x13e   :  { %1098 = vmatprep.subr.bf16.mxu0 %v1428_v18 }
 0x141   :  { %1099 = vmatpush3.bf16.msra.mxu0 %v1226_v59 }
 0x142   :  { %1100 = vmatprep.subr.bf16.mxu0 %v1428_v18 }
 0x145   :  { %1101 = vmatpush3.bf16.msra.mxu0 %v1227_v60 }
 0x146   :  { %1102 = vmatprep.subr.bf16.mxu0 %v1428_v18 }
 0x149   :  { %1103 = vmatpush3.bf16.msra.mxu0 %v1228_v61 }
 0x14a   :  { %1104 = vmatprep.subr.bf16.mxu0 %v1428_v18 }
 0x14d   :  { %1105 = vmatpush3.bf16.msra.mxu0 %v1229_v62 }
 0x14e   :  { %1106 = vmatprep.subr.bf16.mxu0 %v1428_v18 }
 0x151   :  { %1107 = vmatpush3.bf16.msra.mxu0 %v1230_v63 }
 0x152   :  { %1108 = vmatprep.subr.bf16.mxu0 %v1428_v18 }
 0x155   :  { %1109 = vmatpush3.bf16.msra.mxu0 %v1231_v7 }
 0x156   :  { %1110 = vmatprep.subr.bf16.mxu0 %v1428_v18 }
 0x159   :  { %1111 = vmatpush3.bf16.msra.mxu0 %v1232_v8 }
 0x15a   :  { %1136 = vmatprep.subr.bf16.mxu0 %v1428_v18 }
 0x1fc   :  { %v401_v35 = vpop.f32.mrf.mxu0 }
 0x1fd   :  { %v411_v36 = vsel %vm410_vm1, %v401_v35, -1e+09 }
 0x1fe   :  { %v1088_v37 = vpop.f32.mrf.mxu0  ;;  %v414_v38 = vsel %vm413_vm2, %v411_v36, -inf }
 0x1ff   :  { %415 = vmax.xlane.f32.xlu0 %v414_v38 }
 0x200   :  { %v404_v39 = vpop.f32.mrf.mxu0 }
 0x201   :  { %v412_v40 = vsel %vm410_vm1, %v404_v39, -1e+09  ;;  %v1247_v39 = vld [vmem:[#allocation11 + $0x8] sm:$0xff]  }
 0x202   :  { %v1089_v41 = vpop.f32.mrf.mxu0  ;;  %v417_v42 = vsel %vm413_vm2, %v412_v40, -inf }
 0x203   :  { %418 = vmax.xlane.f32.xlu0 %v417_v42  ;;  %v1249_v41 = vld [vmem:[#allocation12 + $0x38] sm:$0xff]   ;;  %v1250_v42 = vld [vmem:[#allocation12 + $0x30] sm:$0xff]  }
 0x288   :  { %v416_v43 = vpop.xlane.xlu0 %415 }
 0x289   :  { %v420_v44 = vsub.f32 %v411_v36, %v416_v43 }
 0x28b   :  { %v422_v45 = vmul.f32 1.442695, %v420_v44 }
 0x28c   :  { %v419_v46 = vpop.xlane.xlu0 %418 }
 0x28d   :  { %1259 = vpow2.f32 %v422_v45  ;;  %v421_v47 = vsub.f32 %v412_v40, %v419_v46  ;;  %v1248_v40 = vld [vmem:[#allocation11] sm:$0xff]  }
 0x28f   :  { %v424_v48 = vmul.f32 1.442695, %v421_v47 }
 0x291   :  { %1261 = vpow2.f32 %v424_v48 }
 0x29a   :  { %v1260_v49 = vpop.eup %1259 }
 0x29b   :  { %v426_v50 = vsel %vm413_vm2, %v1260_v49, 0.0 }
 0x29c   :  { %427 = vadd.xlane.f32.xlu1 %v426_v50  ;;  %v1252_v50 = vld [vmem:[#allocation12 + $0x20] sm:$0xff]  }
 0x29e   :  { %v1262_v51 = vpop.eup %1261 }
 0x29f   :  { %v429_v52 = vsel %vm413_vm2, %v1262_v51, 0.0 }
 0x2a0   :  { %430 = vadd.xlane.f32.xlu1 %v429_v52  ;;  %v1254_v52 = vld [vmem:[#allocation12 + $0x10] sm:$0xff]  }
 0x325   :  { %v428_v0 = vpop.xlane.xlu1 %427 }
 0x326   :  { %1263 = vrcp.f32 %v428_v0 }
 0x329   :  { %v431_v1 = vpop.xlane.xlu1 %430 }
 0x32a   :  { %1265 = vrcp.f32 %v431_v1 }
 0x333   :  { %v1264_v2 = vpop.eup %1263 }
 0x334   :  { %v434_v5 = vmul.f32 %v1264_v2, %v1260_v49 }
 0x337   :  { %v1266_v3 = vpop.eup %1265 }
 0x338   :  { %v435_v4 = vmul.f32 %v1266_v3, %v1262_v51  ;;  %v1253_v51 = vld [vmem:[#allocation12 + $0x18] sm:$0xff]  }
 0x33a   :  { %v436_v6 = vpack.c.bf16 %v435_v4, %v434_v5 }
 0x33c   :  { %1093 = vmatmul.mubr.msk.bf16.vlgmr.msra.gmra.mxu1 %vm413_vm2, %v436_v6 }
 0x33d   :  { %1132 = vmatprep.mubr.msk.bf16.mxu1 %vm1429_vm0, %v1428_v18  ;;  %1117 = vmatpush3.bf16.msra.mxu1 %v1233_v9 }
 0x33e   :  { %1118 = vmatprep.subr.bf16.mxu1 %v1428_v18 }
 0x341   :  { %1119 = vmatpush3.bf16.msra.mxu1 %v1234_v10 }
 0x342   :  { %1120 = vmatprep.subr.bf16.mxu1 %v1428_v18 }
 0x345   :  { %1121 = vmatpush3.bf16.msra.mxu1 %v1235_v11 }
 0x346   :  { %1122 = vmatprep.subr.bf16.mxu1 %v1428_v18 }
 0x349   :  { %1123 = vmatpush3.bf16.msra.mxu1 %v1236_v12 }
 0x34a   :  { %1124 = vmatprep.subr.bf16.mxu1 %v1428_v18 }
 0x34d   :  { %1125 = vmatpush3.bf16.msra.mxu1 %v1237_v13 }
 0x34e   :  { %1126 = vmatprep.subr.bf16.mxu1 %v1428_v18 }
 0x351   :  { %1127 = vmatpush3.bf16.msra.mxu1 %v1238_v14 }
 0x352   :  { %1128 = vmatprep.subr.bf16.mxu1 %v1428_v18 }
 0x355   :  { %1129 = vmatpush3.bf16.msra.mxu1 %v1239_v22 }
 0x356   :  { %1130 = vmatprep.subr.bf16.mxu1 %v1428_v18 }
 0x359   :  { %1131 = vmatpush3.bf16.msra.mxu1 %v1240_v23 }
 0x35a   :  { %1156 = vmatprep.subr.bf16.mxu1 %v1428_v18 }
 0x3fc   :  { %v475_v15 = vpop.f32.mrf.mxu1 }
 0x3fe   :  { %v1094_v16 = vpop.f32.mrf.mxu1 }
 0x400   :  { %v478_v19 = vpop.f32.mrf.mxu1 }
 0x401   :  { %v482_v20 = vpack.c.bf16 %v478_v19, %v475_v15 }
 0x402   :  { %v1095_v21 = vpop.f32.mrf.mxu1 }
 0x403   :  { %1113 = vmatmul.mubr.bf16.vlgmr.msra.gmra.mxu0 %v482_v20 }
 0x404   :  { %1152 = vmatprep.mubr.msk.bf16.mxu0 %vm1429_vm0, %v1428_v18  ;;  %1137 = vmatpush3.bf16.msra.mxu0 %v1241_v24 }
 0x405   :  { %1138 = vmatprep.subr.bf16.mxu0 %v1428_v18 }
 0x408   :  { %1139 = vmatpush3.bf16.msra.mxu0 %v1242_v25 }
 0x409   :  { %1140 = vmatprep.subr.bf16.mxu0 %v1428_v18 }
 0x40c   :  { %1141 = vmatpush3.bf16.msra.mxu0 %v1243_v26 }
 0x40d   :  { %1142 = vmatprep.subr.bf16.mxu0 %v1428_v18 }
 0x410   :  { %1143 = vmatpush3.bf16.msra.mxu0 %v1244_v27 }
 0x411   :  { %1144 = vmatprep.subr.bf16.mxu0 %v1428_v18 }
 0x414   :  { %1145 = vmatpush3.bf16.msra.mxu0 %v1245_v28 }
 0x415   :  { %1146 = vmatprep.subr.bf16.mxu0 %v1428_v18 }
 0x418   :  { %1147 = vmatpush3.bf16.msra.mxu0 %v1246_v29 }
 0x419   :  { %1148 = vmatprep.subr.bf16.mxu0 %v1428_v18 }
 0x41c   :  { %1149 = vmatpush3.bf16.msra.mxu0 %v1247_v39 }
 0x41d   :  { %1150 = vmatprep.subr.bf16.mxu0 %v1428_v18 }
 0x420   :  { %1151 = vmatpush3.bf16.msra.mxu0 %v1248_v40 }
 0x4c3   :  { %v581_v30 = vpop.f32.mrf.mxu0 }
 0x4c4   :  { %v582_v35 = vadd.f32 %v581_v30, %v113_v31 }
 0x4c5   :  { %v1114_v33 = vpop.f32.mrf.mxu0 }
 0x4c7   :  { %v584_v34 = vpop.f32.mrf.mxu0 }
 0x4c8   :  { %v585_v36 = vadd.f32 %v584_v34, %v114_v32 }
 0x4c9   :  { %v1115_v37 = vpop.f32.mrf.mxu0 }
 0x4ca   :  { %v588_v38 = vpack.c.bf16 %v585_v36, %v582_v35 }
 0x4cc   :  { %1133 = vmatmul.mubr.bf16.vlgmr.msra.gmra.mxu1 %v588_v38 }
 0x4cd   :  { %1172 = vmatprep.mubr.msk.bf16.mxu1 %vm1429_vm0, %v1428_v18  ;;  %1157 = vmatpush3.bf16.msra.mxu1 %v1249_v41 }
 0x4ce   :  { %1158 = vmatprep.subr.bf16.mxu1 %v1428_v18 }
 0x4d1   :  { %1159 = vmatpush3.bf16.msra.mxu1 %v1250_v42 }
 0x4d2   :  { %1160 = vmatprep.subr.bf16.mxu1 %v1428_v18 }
 0x4d5   :  { %1161 = vmatpush3.bf16.msra.mxu1 %v1251_v17 }
 0x4d6   :  { %1162 = vmatprep.subr.bf16.mxu1 %v1428_v18 }
 0x4d9   :  { %1163 = vmatpush3.bf16.msra.mxu1 %v1252_v50 }
 0x4da   :  { %1164 = vmatprep.subr.bf16.mxu1 %v1428_v18 }
 0x4dd   :  { %1165 = vmatpush3.bf16.msra.mxu1 %v1253_v51 }
 0x4de   :  { %1166 = vmatprep.subr.bf16.mxu1 %v1428_v18 }
 0x4e1   :  { %1167 = vmatpush3.bf16.msra.mxu1 %v1254_v52 }
 0x4e2   :  { %1168 = vmatprep.subr.bf16.mxu1 %v1428_v18 }
 0x4e5   :  { %1169 = vmatpush3.bf16.msra.mxu1 %v1255_v53 }
 0x4e6   :  { %1170 = vmatprep.subr.bf16.mxu1 %v1428_v18 }
 0x4e9   :  { %1171 = vmatpush3.bf16.msra.mxu1 %v1256_v54 }
 0x58c   :  { %v687_v43 = vpop.f32.mrf.mxu1 }
 0x58d   :  { %v694_v46 = vmax.f32 %v687_v43, 0.0 }
 0x58e   :  { %v1134_v44 = vpop.f32.mrf.mxu1 }
 0x590   :  { %v690_v45 = vpop.f32.mrf.mxu1 }
 0x591   :  { %v695_v47 = vmax.f32 %v690_v45, 0.0 }
 0x592   :  { %v1135_v48 = vpop.f32.mrf.mxu1 }
 0x593   :  { %v696_v49 = vpack.c.bf16 %v695_v47, %v694_v46 }
 0x595   :  { %1153 = vmatmul.mubr.bf16.vlgmr.msra.gmra.mxu0 %v696_v49 }
 0x655   :  { %v795_v55 = vpop.f32.mrf.mxu0 }
 0x656   :  { %v796_v58 = vadd.f32 %v795_v55, %v582_v35 }
 0x657   :  { %v1154_v56 = vpop.f32.mrf.mxu0 }
 0x659   :  { %v798_v57 = vpop.f32.mrf.mxu0 }
 0x65a   :  { %v799_v59 = vadd.f32 %v798_v57, %v585_v36 }
 0x65b   :  { %v1155_v60 = vpop.f32.mrf.mxu0 }
 0x65c   :  { %v1013_v61 = vpack.c.bf16 %v799_v59, %v796_v58 }
 0x65e   :  { %1014 = vst [vmem:[#allocation2] sm:$0xff] %v1013_v61  }
 0x665   :  { %v1257_v62 = vld [vmem:[#allocation2] sm:$0xff]  }
 0x666   :  { %1173 = vmatmul.mubr.bf16.vlgmr.msra.gmra.mxu1 %v1257_v62 }
 0x726   :  { %v918_v63 = vpop.f32.mrf.mxu1 }
 0x727   :  { %925 = vst [vmem:[#allocation14] sm:$0xff] %v918_v63 }
 0x728   :  { %v1174_v0 = vpop.f32.mrf.mxu1 }
 0x72a   :  { %v921_v1 = vpop.f32.mrf.mxu1 }
 0x72b   :  { %926 = vst [vmem:[#allocation14 + $0x8] sm:$0xff] %v921_v1 }
 0x72c   :  { %v1175_v18 = vpop.f32.mrf.mxu1 }
 0x72d   :  { %1398 = shalt.err (!%p1395_p6)
}
 0x72e   :  { %s1431_s28 = smov 128   ;;  %s1432_s29 = smov 8  }
 0x72f   :  { %938 = dma.vmem_to_hbm [thread:$0]  %s933_s5, 256, %s1577_s6, [#allocation5], %s1431_s28, %s1431_s28, %s1432_s29  }
 0x730   :  { %1415 = dma.done.wait [#allocation5], 256  }
 0x731   :  { %1416 = vsyncadd [#allocation5], 4294967040 }
 0x732   :  { %942 = vsyncpa [#allocation4], 1 }
 0x733   :  { %943 = vsyncpa [#allocation7], 1 }
 0x734   :  { %944 = vsyncpa [#allocation10], 1 }
 0x735   :  { %945 = vsyncpa [#allocation13], 1 }
 0x736   :  { %946 = vsyncpa [#allocation5], 1 }

</bundles_post_ra>
